<compile_context>
chip_gen: v6e
topology: v6e:2x2x1
jax: 0.10.0
libtpu: 0.0.40
codegen_flags: <defaults>
</compile_context>

<pallas_src>
import math
import numpy as np
import jax
import jax.numpy as jnp
from jax.experimental import pallas as pl
from jax.experimental.pallas import tpu as pltpu

_SQRT2 = float(np.sqrt(2.0))
_OUT_TILE_BYTES = 2 << 20     # target output tile ~2 MiB
_MAX_RHS_BYTES = 4 << 20      # cap for the VMEM-resident [freqs; phases] matrix


def _round_up(a, b):
    return (a + b - 1) // b * b


def _mpfourier_kernel(lhs_ref, rhs_ref, o_ref):
    # lhs (bm, R+1) f32 : R packed x values + trailing ones column.
    # rhs (R+1, L) f32  : block-diagonal freqs (rows 0..R-1), tiled phases (row R).
    # Single MXU matmul realizes outer(x, freqs) + phases; HIGHEST precision so
    # the f32 multi-pass matmul matches f32 FMA (cos is sensitive to arg error).
    y = jnp.dot(lhs_ref[...], rhs_ref[...],
                preferred_element_type=jnp.float32,
                precision=jax.lax.Precision.HIGHEST)
    o_ref[...] = (jnp.cos(y) * _SQRT2).astype(o_ref.dtype)


def _mp_fourier_impl(x, freqs, phases):
    N = int(x.shape[0])
    C = int(freqs.shape[0])
    out_dtype = x.dtype
    itemsize = jnp.dtype(out_dtype).itemsize
    sub = {4: 8, 2: 16, 1: 32}.get(itemsize, 8)          # sublane pack multiple

    # Lane packing: smallest R with (R*C) % 128 == 0 -> full-lane stores.
    R = 128 // math.gcd(C, 128)
    L = R * C
    if (R + 1) * L * 4 > _MAX_RHS_BYTES:                  # pathological C: keep rhs
        R, L = 1, C                                       # small; masked tail store.

    Nr = -(-N // R)                                       # packed rows with real data
    Nro = max(_round_up(Nr, sub), sub)                    # physical rows (sublane only)

    # Row tile from a byte budget; ensure >=2 grid steps when possible (v7x 2 TCs).
    bm = max(sub, min((_OUT_TILE_BYTES // max(L * itemsize, 1)) // sub * sub, Nro))
    if Nro >= 2 * sub:
        bm = min(bm, _round_up(-(-Nro // 2), sub))
    grid = -(-Nro // bm)

    # ---- tiny wrapper-side operands (fused under jit) -----------------------
    f = freqs.astype(jnp.float32)
    p = phases.astype(jnp.float32)
    if R == 1:
        rhs = jnp.stack([f, p], axis=0)                                    # (2, C)
    else:
        F = (jnp.eye(R, dtype=jnp.float32)[:, :, None] * f[None, None, :]).reshape(R, L)
        rhs = jnp.concatenate([F, jnp.tile(p, R)[None, :]], axis=0)        # (R+1, L)

    xf = x.astype(jnp.float32)
    pad = Nro * R - N
    if pad:
        xf = jnp.pad(xf, (0, pad))
    lhs = jnp.concatenate(
        [xf.reshape(Nro, R), jnp.ones((Nro, 1), jnp.float32)], axis=1)     # (Nro, R+1)

    cost = pl.CostEstimate(
        flops=2 * grid * bm * (R + 1) * L,
        transcendentals=grid * bm * L,
        bytes_accessed=Nro * (R + 1) * 4 + (R + 1) * L * 4 + Nro * L * itemsize,
    )

    out = pl.pallas_call(
        _mpfourier_kernel,
        out_shape=jax.ShapeDtypeStruct((Nro, L), out_dtype),
        grid_spec=pltpu.PrefetchScalarGridSpec(
            num_scalar_prefetch=0,
            grid=(grid,),
            in_specs=[
                pl.BlockSpec((bm, R + 1), lambda i: (i, 0)),
                pl.BlockSpec((R + 1, L), lambda i: (0, 0)),   # VMEM-resident
            ],
            out_specs=pl.BlockSpec((bm, L), lambda i: (i, 0)),
        ),
        compiler_params=pltpu.CompilerParams(
            dimension_semantics=("parallel",),
            vmem_limit_bytes=32 << 20,      # footprint ~5 MiB; safe on v5e/v6e/v7x
        ),
        cost_estimate=cost,
    )(lhs, rhs)

    out = out.reshape(Nro * R, C)           # free row-major reshape
    if Nro * R != N:
        out = out[:N]                       # only when N isn't packing-aligned
    return out


mp_fourier = jax.jit(_mp_fourier_impl)


if __name__ == "__main__":
    key = jax.random.PRNGKey(0)
    k_freq, k_phase, k_x = jax.random.split(key, 3)

    # --- Case 1: C=32 (lane-packed path, R=4), f32 timesteps ----------------
    num_channels = 32
    bandwidth = 1.0
    batch = 8
    # Deterministic "buffer" init mirroring PyTorch __init__:
    #   freqs = 2*pi*randn(C)*bandwidth ; phases = 2*pi*rand(C)
    freqs = 2.0 * np.pi * jax.random.normal(k_freq, (num_channels,), dtype=jnp.float32) * bandwidth
    phases = 2.0 * np.pi * jax.random.uniform(k_phase, (num_channels,), dtype=jnp.float32)
    x = jax.random.normal(k_x, (batch,), dtype=jnp.float32)

    out = jax.block_until_ready(mp_fourier(x, freqs, phases))
    ref = (jnp.cos(jnp.outer(x.astype(jnp.float32), freqs) + phases) * _SQRT2).astype(x.dtype)
    assert out.shape == (batch, num_channels)
    assert out.dtype == x.dtype
    np.testing.assert_allclose(np.asarray(out), np.asarray(ref), rtol=1e-4, atol=1e-4)

    # --- Case 2: C=192 (lane-packed path, R=2), bf16 x, ragged N ------------
    num_channels2 = 192
    batch2 = 50
    freqs2 = 2.0 * np.pi * jax.random.normal(k_freq, (num_channels2,), dtype=jnp.float32)
    phases2 = 2.0 * np.pi * jax.random.uniform(k_phase, (num_channels2,), dtype=jnp.float32)
    x_b = jax.random.normal(k_x, (batch2,), dtype=jnp.bfloat16)

    out2 = jax.block_until_ready(mp_fourier(x_b, freqs2, phases2))
    ref2 = (jnp.cos(jnp.outer(x_b.astype(jnp.float32), freqs2) + phases2) * _SQRT2).astype(x_b.dtype)
    assert out2.shape == (batch2, num_channels2)
    assert out2.dtype == x_b.dtype
    np.testing.assert_allclose(np.asarray(out2.astype(jnp.float32)),
                               np.asarray(ref2.astype(jnp.float32)),
                               rtol=2e-2, atol=2e-2)

    # --- Case 3: C=256 (unpacked path, R=1, K=2 matmul), f32, ragged N ------
    num_channels3 = 256
    batch3 = 20
    freqs3 = 2.0 * np.pi * jax.random.normal(k_freq, (num_channels3,), dtype=jnp.float32)
    phases3 = 2.0 * np.pi * jax.random.uniform(k_phase, (num_channels3,), dtype=jnp.float32)
    x3 = jax.random.normal(k_x, (batch3,), dtype=jnp.float32)

    out3 = jax.block_until_ready(mp_fourier(x3, freqs3, phases3))
    ref3 = (jnp.cos(jnp.outer(x3, freqs3) + phases3) * _SQRT2).astype(x3.dtype)
    assert out3.shape == (batch3, num_channels3)
    np.testing.assert_allclose(np.asarray(out3), np.asarray(ref3), rtol=1e-4, atol=1e-4)

    print("KERNEL_OK")
</pallas_src>

<mosaic_0001>
module attributes {stable_mosaic.version = 11 : i64} {
  func.func @_mpfourier_kernel(%arg0: i32, %arg1: memref<8x5xf32, #tpu.memory_space<vmem>>, %arg2: memref<5x128xf32, #tpu.memory_space<vmem>>, %arg3: memref<8x128xf32, #tpu.memory_space<vmem>>) attributes {dimension_semantics = [#tpu.dimension_semantics<parallel>], iteration_bounds = array<i64: 1>, scalar_prefetch = 0 : i64, scratch_operands = 0 : i64, tpu.core_type = #tpu.core_type<tc>, window_params = [{transform_indices = @transform_0, window_bounds = array<i64: 8, 5>}, {pipeline_mode = #tpu.pipeline_mode<synchronous>, transform_indices = @transform_1, window_bounds = array<i64: 5, 128>}, {transform_indices = @transform_2, window_bounds = array<i64: 8, 128>}]} {
    %c0 = arith.constant 0 : index
    %c0_0 = arith.constant 0 : index
    %0 = vector.load %arg1[%c0, %c0_0] : memref<8x5xf32, #tpu.memory_space<vmem>>, vector<8x5xf32>
    %c0_1 = arith.constant 0 : index
    %c0_2 = arith.constant 0 : index
    %1 = vector.load %arg2[%c0_1, %c0_2] : memref<5x128xf32, #tpu.memory_space<vmem>>, vector<5x128xf32>
    %cst = arith.constant dense<0.000000e+00> : vector<8x128xf32>
    %2 = tpu.matmul %0, %1, %cst {dimension_numbers = #tpu.dot_dimension_numbers<[1], [0], [0], [1], [0, 0, 1, 1], [], []>, precision = #tpu.contract_precision<fp32>} : vector<8x5xf32>, vector<5x128xf32>, vector<8x128xf32> -> vector<8x128xf32>
    %3 = math.cos %2 : vector<8x128xf32>
    %cst_3 = arith.constant 1.41421354 : f32
    %4 = vector.broadcast %cst_3 : f32 to vector<8x128xf32>
    %5 = arith.mulf %3, %4 : vector<8x128xf32>
    %c0_4 = arith.constant 0 : index
    %c0_5 = arith.constant 0 : index
    %6 = vector.load %arg3[%c0_4, %c0_5] : memref<8x128xf32, #tpu.memory_space<vmem>>, vector<8x128xf32>
    tpu.vector_store %arg3[%c0_4, %c0_5], %5 {strides = array<i32>} : memref<8x128xf32, #tpu.memory_space<vmem>>, vector<8x128xf32>,
    return
  }
  func.func @transform_0(%arg0: i32) -> (i32, i32) {
    %c0_i32 = arith.constant 0 : i32
    %c0_i32_0 = arith.constant 0 : i32
    return %arg0, %c0_i32 : i32, i32
  }
  func.func @transform_1(%arg0: i32) -> (i32, i32) {
    %c0_i32 = arith.constant 0 : i32
    %c0_i32_0 = arith.constant 0 : i32
    %c0_i32_1 = arith.constant 0 : i32
    return %c0_i32, %c0_i32_0 : i32, i32
  }
  func.func @transform_2(%arg0: i32) -> (i32, i32) {
    %c0_i32 = arith.constant 0 : i32
    %c0_i32_0 = arith.constant 0 : i32
    return %arg0, %c0_i32 : i32, i32
  }
}

</mosaic_0001>

<bundles_post_ra>
// kernel: tile.9
= control target key start
LH: loop header
LB: loop body
LE: loop exit
PB: predicated region body
PF: predicated region fallthrough
CT: control target
= control target key end

     0   :  { %vm8_vm0 = vcmask 261120   ;;  %s40_s8 = smov 32   ;;  %s41_s9 = smov 64   ;;  %vm14_vm1 = vcmask 1048320   ;;  %vm20_vm2 = vcmask 785920   ;;  %vm26_vm3 = vcmask 523520   ;;  %s58_s0 = inlined_call_operand.vmem [shape: f32[4,32], index: 0, kind: input, shape index: {}]   ;;  %s59_s1 = inlined_call_operand.vmem [shape: f32[1,128], index: 1, kind: output, shape index: {}]  }
   0x1   :  { %v5_v0 = vld [vmem:[%s58_s0] sm:$0xf]  ;;  %s39_s0 = smov 96  }
   0x2   :  { %6 = vst [vmem:[#allocation1] sm:$0xf] %v5_v0 }
   0x9   :  { %v11_v1 = vld [vmem:[#allocation1 + $0x3] sm:$0x1]   ;;  %v23_v2 = vld [vmem:[#allocation1 + $0x1] sm:$0x1]   ;;  %v7_v3 = vld [vmem:[#allocation1] sm:$0x1]  }
   0xa   :  { %12 = vrot.lane.b32.xlu0 %v11_v1, %s39_s0  ;;  %24 = vrot.lane.b32.xlu1 %v23_v2, %s40_s8  ;;  %v17_v4 = vld [vmem:[#allocation1 + $0x2] sm:$0x1]   ;;  %9 = vst.msk [vmem:[#allocation0] sm:$0x1] %vm8_vm0, %v7_v3  }
   0xe   :  { %18 = vrot.lane.b32.xlu0 %v17_v4, %s41_s9 }
  0x7c   :  { %v13_v5 = vpop.permute.xlu0 %12   ;;  %v25_v6 = vpop.permute.xlu1 %24  }
  0x7d   :  { %15 = vst.msk [vmem:[#allocation0] sm:$0x1] %vm14_vm1, %v13_v5  }
  0x80   :  { %v19_v7 = vpop.permute.xlu0 %18  }
  0x81   :  { %21 = vst.msk [vmem:[#allocation0] sm:$0x1] %vm20_vm2, %v19_v7  }
  0x82   :  { %27 = vst.msk [vmem:[#allocation0] sm:$0x1] %vm26_vm3, %v25_v6  }
  0x89   :  { %v32_v8 = vld [vmem:[#allocation0] sm:$0x1] }
  0x8a   :  { %35 = vst [vmem:[%s59_s1] sm:$0x1] %v32_v8 }

// kernel: _mp_fourier_impl.1
= control target key start
LH: loop header
LB: loop body
LE: loop exit
PB: predicated region body
PF: predicated region fallthrough
CT: control target
= control target key end

     0   :  { %vm17_vm0 = vcmask 1044480   ;;  %vm13_vm1 = vcmask 39936   ;;  %v638_v0 = vmov 0.0   ;;  %vm639_vm2 = vmmov 0   ;;  %s697_s1 = inlined_call_operand.vmem [shape: f32[5,128], index: 1, kind: input, shape index: {}]   ;;  %s698_s0 = inlined_call_operand.vmem [shape: f32[8,5], index: 0, kind: input, shape index: {}]   ;;  %s699_s2 = inlined_call_operand.vmem [shape: f32[8,128], index: 2, kind: output, shape index: {}]  }
   0x1   :  { %592 = vmatprep.subr.mxu0 %v638_v0  ;;  %v12_v1 = vld [vmem:[%s697_s1] sm:$0x1f]  ;;  %594 = vmatprep.mubr.msk.f32.mxu0 %vm639_vm2, %v638_v0  ;;  %v640_v42 = vmov 683565275   ;;  %v641_v44 = vmov 2475754826  }
   0x2   :  { %v11_v2 = vld [vmem:[%s698_s0] sm:$0xff]  ;;  %v19_v3 = vsel %vm17_vm0, %v12_v1, 0  ;;  %597 = vmatprep.subr.mxu1 %v638_v0  ;;  %599 = vmatprep.mubr.msk.f32.mxu1 %vm639_vm2, %v638_v0  ;;  %v642_v47 = vmov 2131351028   ;;  %v643_v50 = vmov 2102212464  }
   0x3   :  { %v15_v4 = vsel %vm13_vm1, %v11_v2, 0  ;;  %v52_v5 = vand.u32 4294901760, %v19_v3  ;;  %v644_v53 = vmov 920167782   ;;  %v645_v56 = vmov 1326507024  }
   0x4   :  { %v87_v6 = vand.u32 4294901760, %v15_v4 }
   0x5   :  { %593 = vmatpush3.msra.mxu0 %v52_v5  ;;  %v129_v8 = vsub.f32 %v19_v3, %v52_v5 }
   0x6   :  { %v88_v7 = vsub.f32 %v15_v4, %v87_v6  ;;  %602 = vmatprep.subr.mxu0 %v638_v0 }
   0x7   :  { %v130_v10 = vand.u32 4294901760, %v129_v8 }
   0x8   :  { %v89_v9 = vand.u32 4294901760, %v88_v7 }
   0x9   :  { %v131_v12 = vsub.f32 %v129_v8, %v130_v10 }
   0xa   :  { %v90_v11 = vsub.f32 %v88_v7, %v89_v9 }
   0xb   :  { %v132_v14 = vand.u32 4294901760, %v131_v12 }
   0xc   :  { %v91_v13 = vand.u32 4294901760, %v90_v11 }
   0xd   :  { %598 = vmatpush3.msra.mxu1 %v132_v14 }
   0xe   :  { %595 = vmatmul.mubr.f32.vlgmr.msra.gmra.mxu0 %v91_v13  ;;  %600 = vmatmul.mubr.f32.vlgmr.msra.gmra.mxu1 %v87_v6 }
   0xf   :  { %603 = vmatpush3.msra.mxu0 %v129_v8  ;;  %607 = vmatprep.subr.mxu1 %v638_v0 }
  0x10   :  { %604 = vmatprep.mubr.msk.f32.mxu0 %vm639_vm2, %v638_v0  ;;  %608 = vmatpush3.msra.mxu1 %v52_v5 }
  0x11   :  { %612 = vmatprep.subr.mxu0 %v638_v0  ;;  %609 = vmatprep.mubr.msk.f32.mxu1 %vm639_vm2, %v638_v0 }
  0x12   :  { %605 = vmatmul.mubr.f32.vlgmr.msra.gmra.mxu0 %v88_v7  ;;  %610 = vmatmul.mubr.f32.vlgmr.msra.gmra.mxu1 %v89_v9 }
  0x13   :  { %613 = vmatpush3.msra.mxu0 %v130_v10  ;;  %617 = vmatprep.subr.mxu1 %v638_v0 }
  0x14   :  { %614 = vmatprep.mubr.msk.f32.mxu0 %vm639_vm2, %v638_v0  ;;  %618 = vmatpush3.msra.mxu1 %v52_v5 }
  0x15   :  { %619 = vmatprep.mubr.msk.f32.mxu1 %vm639_vm2, %v638_v0 }
  0x16   :  { %615 = vmatmul.mubr.f32.vlgmr.msra.gmra.mxu0 %v87_v6  ;;  %620 = vmatmul.mubr.f32.vlgmr.msra.gmra.mxu1 %v87_v6 }
  0xce   :  { %v93_v15 = vpop.f32.mrf.mxu0  ;;  %v169_v16 = vpop.f32.mrf.mxu1 }
  0xcf   :  { %v170_v17 = vadd.f32 %v169_v16, %v93_v15 }
  0xd0   :  { %v596_v18 = vpop.f32.mrf.mxu0  ;;  %v601_v19 = vpop.f32.mrf.mxu1 }
  0xd2   :  { %v243_v20 = vpop.f32.mrf.mxu0  ;;  %v317_v22 = vpop.f32.mrf.mxu1 }
  0xd3   :  { %v244_v21 = vadd.f32 %v243_v20, %v170_v17 }
  0xd4   :  { %v606_v23 = vpop.f32.mrf.mxu0  ;;  %v611_v25 = vpop.f32.mrf.mxu1 }
  0xd5   :  { %v318_v24 = vadd.f32 %v317_v22, %v244_v21 }
  0xd6   :  { %v391_v26 = vpop.f32.mrf.mxu0  ;;  %v463_v28 = vpop.f32.mrf.mxu1 }
  0xd7   :  { %v392_v27 = vadd.f32 %v391_v26, %v318_v24 }
  0xd8   :  { %v616_v29 = vpop.f32.mrf.mxu0  ;;  %v621_v31 = vpop.f32.mrf.mxu1 }
  0xd9   :  { %v673_v30 = vadd.f32 %v463_v28, %v392_v27 }
  0xdb   :  { %v470_v32 = vand.u32 2139095040, %v673_v30  ;;  %v467_v36 = vand.u32 2147483647, %v673_v30  ;;  %vm469_vm10 = vcmp.lt.s32.totalorder %v673_v30, 0  ;;  %vm559_vm15 = vweird.f32 %v673_v30 }
  0xdd   :  { %v471_v33 = vshrl.u32 %v470_v32, 23  ;;  %v474_v39 = vand.u32 8388607, %v467_v36  ;;  %vm468_vm11 = vcmp.le.f32.partialorder %v467_v36, 0.7853982 }
  0xdf   :  { %v576_v34 = vadd.s32 4294967169, %v471_v33  ;;  %v475_v58 = vor.u32 8388608, %v474_v39 }
  0xe1   :  { %v477_v35 = vadd.s32 1, %v576_v34  ;;  %v515_v8 = vshll.u32 %v475_v58, 8 }
  0xe3   :  { %vm478_vm3 = vcmp.gt.s32.totalorder %v477_v35, 0 }
  0xe4   :  { %v479_v37 = vsel %vm478_vm3, %v477_v35, 0 }
  0xe5   :  { %v481_v38 = vand.u32 31, %v479_v37  ;;  %v480_v41 = vshrl.u32 %v479_v37, 5 }
  0xe7   :  { %v482_v40 = vsub.s32 32, %v481_v38  ;;  %v484_v43 = vshll.u32 %v640_v42, %v481_v38  ;;  %v487_v45 = vshll.u32 %v641_v44, %v481_v38  ;;  %v490_v49 = vshll.u32 %v642_v47, %v481_v38 }
  0xe8   :  { %v493_v52 = vshll.u32 %v643_v50, %v481_v38  ;;  %v496_v55 = vshll.u32 %v644_v53, %v481_v38  ;;  %vm499_vm4 = vcmp.lt.s32.totalorder %v480_v41, 1  ;;  %vm502_vm5 = vcmp.lt.s32.totalorder %v480_v41, 4 }
  0xe9   :  { %v485_v46 = vshrl.u32 %v641_v44, %v482_v40  ;;  %v488_v48 = vshrl.u32 %v642_v47, %v482_v40  ;;  %v491_v51 = vshrl.u32 %v643_v50, %v482_v40  ;;  %v494_v54 = vshrl.u32 %v644_v53, %v482_v40 }
  0xea   :  { %v497_v57 = vshrl.u32 %v645_v56, %v482_v40  ;;  %v483_v3 = vshrl.u32 %v640_v42, %v482_v40  ;;  %vm501_vm6 = vcmp.lt.s32.totalorder %v480_v41, 3  ;;  %vm500_vm7 = vcmp.lt.s32.totalorder %v480_v41, 2 }
  0xeb   :  { %v486_v59 = vor.u32 %v485_v46, %v484_v43  ;;  %v489_v60 = vor.u32 %v488_v48, %v487_v45  ;;  %v492_v61 = vor.u32 %v491_v51, %v490_v49  ;;  %v495_v62 = vor.u32 %v494_v54, %v493_v52 }
  0xec   :  { %v498_v63 = vor.u32 %v497_v57, %v496_v55 }
  0xed   :  { %v504_v0 = vsel %vm502_vm5, %v492_v61, 2102212464  ;;  %v507_v1 = vsel %vm499_vm4, %v486_v59, %v489_v60  ;;  %v511_v2 = vsel %vm499_vm4, %v489_v60, %v492_v61  ;;  %v508_v4 = vsel %vm502_vm5, %v495_v62, 920167782 }
  0xee   :  { %v512_v5 = vsel %vm502_vm5, %v498_v63, 1326507024  ;;  %v509_v6 = vsel %vm501_vm6, %v492_v61, %v508_v4  ;;  %v503_v9 = vsel %vm499_vm4, %v483_v3, %v486_v59  ;;  %v505_v10 = vsel %vm501_vm6, %v489_v60, %v504_v0 }
  0xef   :  { %v513_v7 = vsel %vm501_vm6, %v495_v62, %v512_v5  ;;  %v510_v11 = vsel %vm500_vm7, %v507_v1, %v509_v6  ;;  %v506_v17 = vsel %vm500_vm7, %v503_v9, %v505_v10 }
  0xf0   :  { %v514_v12 = vsel %vm500_vm7, %v511_v2, %v513_v7  ;;  %v682_v15 = vmul.u32.u64.low %v515_v8, %v510_v11  ;;  %v683_v16 = vmul.u32.u64.high %v515_v8, %v510_v11, %v682_v15  ;;  %v522_v19 = vmul.u32 %v515_v8, %v506_v17 }
  0xf1   :  { %v679_v13 = vmul.u32.u64.low %v515_v8, %v514_v12  ;;  %v680_v14 = vmul.u32.u64.high %v515_v8, %v514_v12, %v679_v13 }
  0xf2   :  { %v525_v18 = vadd.s32 1, %v683_v16 }
  0xf3   :  { %vm524_vm8 = vc.u32 %v680_v14, %v682_v15  ;;  %v523_v32 = vadd.s32 %v682_v15, %v680_v14 }
  0xf4   :  { %v526_v20 = vsel %vm524_vm8, %v525_v18, %v683_v16 }
  0xf5   :  { %v527_v21 = vadd.s32 %v526_v20, %v522_v19 }
  0xf7   :  { %v528_v22 = vadd.s32 536870912, %v527_v21 }
  0xf9   :  { %v529_v23 = vshrl.u32 %v528_v22, 30 }
  0xfb   :  { %v530_v24 = vshll.u32 %v529_v23, 30  ;;  %v553_v48 = vsub.s32 4, %v529_v23 }
  0xfd   :  { %v531_v25 = vsub.s32 %v527_v21, %v530_v24  ;;  %v554_v49 = vsel %vm469_vm10, %v553_v48, %v529_v23 }
  0xfe   :  { %v556_v50 = vsel %vm468_vm11, 0, %v554_v49 }
  0xff   :  { %v533_v26 = vsub.s32 0, %v531_v25  ;;  %v560_v51 = vand.u32 3, %v556_v50 }
 0x101   :  { %v577_v27 = vmin.u32 %v533_v26, %v531_v25  ;;  %vm565_vm12 = vcmp.eq.s32.totalorder %v560_v51, 2  ;;  %vm562_vm13 = vcmp.eq.s32.totalorder %v560_v51, 0  ;;  %vm561_vm14 = vcmp.lt.s32.totalorder %v560_v51, 2 }
 0x103   :  { %v535_v28 = vclz %v577_v27 }
 0x105   :  { %v578_v29 = vadd.s32 4294967294, %v535_v28 }
 0x107   :  { %vm579_vm9 = vcmp.lt.s32.totalorder %v578_v29, 0 }
 0x108   :  { %v538_v31 = vsel %vm579_vm9, 0, %v578_v29 }
 0x109   :  { %v539_v33 = vsub.s32 32, %v538_v31  ;;  %v543_v34 = vsub.s32 4294967266, %v538_v31  ;;  %v540_v35 = vshll.u32 %v531_v25, %v538_v31 }
 0x10b   :  { %v541_v37 = vshrl.u32 %v523_v32, %v539_v33  ;;  %v544_v38 = vadd.s32 127, %v543_v34 }
 0x10d   :  { %v542_v39 = vor.u32 %v541_v37, %v540_v35  ;;  %v545_v40 = vshll.u32 %v544_v38, 23 }
 0x10f   :  { %v546_v41 = vor.u32 4788187, %v545_v40  ;;  %v549_v43 = vcvt.s32.f32 %v542_v39 }
 0x111   :  { %v547_v42 = vand.u32 2147483647, %v546_v41 }
 0x113   :  { %v550_v44 = vmul.f32 %v549_v43, %v547_v42 }
 0x115   :  { %v551_v45 = vxor.u32 2147483648, %v550_v44 }
 0x117   :  { %v552_v46 = vsel %vm469_vm10, %v551_v45, %v550_v44 }
 0x118   :  { %v555_v47 = vsel %vm468_vm11, %v673_v30, %v552_v46 }
 0x119   :  { %634 = vcosq.f32 %v555_v47 }
 0x11a   :  { %636 = vsinq.f32 %v555_v47 }
 0x126   :  { %v635_v52 = vpop.eup %634 }
 0x127   :  { %v637_v53 = vpop.eup %636  ;;  %v566_v54 = vxor.u32 2147483648, %v635_v52 }
 0x128   :  { %v563_v55 = vxor.u32 2147483648, %v637_v53 }
 0x129   :  { %v567_v56 = vsel %vm565_vm12, %v566_v54, %v637_v53 }
 0x12a   :  { %v564_v57 = vsel %vm562_vm13, %v635_v52, %v563_v55 }
 0x12b   :  { %v568_v36 = vsel %vm561_vm14, %v564_v57, %v567_v56 }
 0x12c   :  { %v569_v58 = vsel %vm559_vm15, nan, %v568_v36 }
 0x12d   :  { %v570_v59 = vmul.f32 1.4142135, %v569_v58 }
 0x12f   :  { %571 = vst [vmem:[%s699_s2] sm:$0xff] %v570_v59 }

</bundles_post_ra>
